<compile_context>
chip_gen: v5e
topology: v5e:2x2
jax: 0.10.0
libtpu: 0.0.40
codegen_flags: <defaults>
</compile_context>

<pallas_src>
import functools

import jax
import jax.numpy as jnp
from jax.experimental import pallas as pl
from jax.experimental.pallas import tpu as pltpu

N_CLASSES = 4  # TODO(synk): N_CLASSES is an undefined global in the reference model; fixed to 4 here.

_LANE = 128
_VMEM_TILE_BUDGET = 12 * 1024 * 1024   # conservative: fits v7x (64 MiB) as well as v5e/v6e
_MAX_TILE_M = 256                      # rows per grid step (multiple of 8)


def _round_up(x, m):
    return (x + m - 1) // m * m


# -----------------------------------------------------------------------------
# Core Pallas kernel: (TM, Kp)@(Kp, Cp) on the MXU + bias [+ ReLU] [+ BN stats]
# -----------------------------------------------------------------------------
def _matmul_bias_kernel(x_ref, w_ref, b_ref, o_ref, *stats_refs, relu, m_valid, tile_m):
    acc = jnp.dot(x_ref[...], w_ref[...], preferred_element_type=jnp.float32)
    acc = acc + b_ref[...]
    if relu:
        acc = jnp.maximum(acc, 0.0)
    o_ref[...] = acc
    if stats_refs:
        sum_ref, sq_ref = stats_refs
        row = pl.program_id(0) * tile_m + jax.lax.broadcasted_iota(jnp.int32, (tile_m, 1), 0)
        y = jnp.where(row < m_valid, acc, 0.0)          # keep padded rows out of the stats
        sum_ref[...] = jnp.sum(y, axis=0, keepdims=True)[None]
        sq_ref[...] = jnp.sum(y * y, axis=0, keepdims=True)[None]


def _pick_tile_m(m, k_pad, c_pad):
    tm = _MAX_TILE_M
    while tm > 8:
        need = 2 * (tm * k_pad * 2)      # bf16 cols tile, double-buffered
        need += 2 * (tm * c_pad * 4)     # f32 output tile, double-buffered
        need += 2 * (k_pad * c_pad * 2)  # resident bf16 weights
        if need <= _VMEM_TILE_BUDGET:
            break
        tm //= 2
    return max(8, min(tm, _round_up(m, 8)))


def _matmul_bias(x, w, b, *, relu, want_stats):
    """y = [relu](x @ w + b), tiled over rows on the MXU (bf16 operands, f32 accum)."""
    m, k = x.shape
    cout = w.shape[1]
    k_pad = _round_up(k, _LANE)
    c_pad = _round_up(cout, _LANE)
    tile_m = _pick_tile_m(m, k_pad, c_pad)
    n_tiles = pl.cdiv(m, tile_m)
    m_pad = n_tiles * tile_m

    xb = jnp.pad(x.astype(jnp.bfloat16), ((0, m_pad - m), (0, k_pad - k)))
    wb = jnp.pad(w.astype(jnp.bfloat16), ((0, k_pad - k), (0, c_pad - cout)))
    bb = jnp.pad(b.astype(jnp.float32).reshape(1, cout), ((0, 0), (0, c_pad - cout)))

    kernel = functools.partial(_matmul_bias_kernel, relu=relu, m_valid=m, tile_m=tile_m)
    in_specs = [
        pl.BlockSpec((tile_m, k_pad), lambda i: (i, 0)),
        pl.BlockSpec((k_pad, c_pad), lambda i: (0, 0)),   # constant -> stays resident
        pl.BlockSpec((1, c_pad), lambda i: (0, 0)),
    ]
    y_shape = jax.ShapeDtypeStruct((m_pad, c_pad), jnp.float32)
    y_spec = pl.BlockSpec((tile_m, c_pad), lambda i: (i, 0))
    cparams = pltpu.CompilerParams(
        dimension_semantics=("parallel",),                # 2 TCs on v7x can split the row tiles
        vmem_limit_bytes=32 * 1024 * 1024,
    )

    if want_stats:
        out_shape = (
            y_shape,
            jax.ShapeDtypeStruct((n_tiles, 1, c_pad), jnp.float32),
            jax.ShapeDtypeStruct((n_tiles, 1, c_pad), jnp.float32),
        )
        out_specs = (
            y_spec,
            pl.BlockSpec((1, 1, c_pad), lambda i: (i, 0, 0)),
            pl.BlockSpec((1, 1, c_pad), lambda i: (i, 0, 0)),
        )
        y, s_tiles, ss_tiles = pl.pallas_call(
            kernel, out_shape=out_shape, grid=(n_tiles,),
            in_specs=in_specs, out_specs=out_specs, compiler_params=cparams,
        )(xb, wb, bb)
        ssum = jnp.sum(s_tiles, axis=(0, 1))[:cout]
        ssq = jnp.sum(ss_tiles, axis=(0, 1))[:cout]
        return y[:m, :cout], ssum, ssq

    y = pl.pallas_call(
        kernel, out_shape=y_shape, grid=(n_tiles,),
        in_specs=in_specs, out_specs=y_spec, compiler_params=cparams,
    )(xb, wb, bb)
    return y[:m, :cout]


# -----------------------------------------------------------------------------
# Conv layers built on the Pallas matmul
# -----------------------------------------------------------------------------
def _im2col_3x3(xp, out_h, out_w):
    """xp: (N, out_h+2, out_w+2, C) pre-padded -> (N*out_h*out_w, 9*C) patch matrix."""
    n, c = xp.shape[0], xp.shape[-1]
    cols = jnp.concatenate(
        [xp[:, dy:dy + out_h, dx:dx + out_w, :] for dy in range(3) for dx in range(3)],
        axis=-1,
    )
    return cols.reshape(n * out_h * out_w, 9 * c)


def _w3x3_to_mat(w_oihw):
    cout, cin = w_oihw.shape[0], w_oihw.shape[1]
    return jnp.transpose(w_oihw, (2, 3, 1, 0)).reshape(9 * cin, cout)


def _conv3x3_relu_bn(x, w, b, gamma, beta, eps=1e-5):
    """Conv2d(k=3, pad=1) -> ReLU -> BatchNorm2d (training-mode batch statistics)."""
    n, h, wd, _ = x.shape
    cout = w.shape[0]
    m = n * h * wd
    xp = jnp.pad(x, ((0, 0), (1, 1), (1, 1), (0, 0)))
    y, ssum, ssq = _matmul_bias(_im2col_3x3(xp, h, wd), _w3x3_to_mat(w), b,
                                relu=True, want_stats=True)
    mean = ssum / m
    var = jnp.maximum(ssq / m - mean * mean, 0.0)         # biased variance, like PyTorch training BN
    scale = gamma * jax.lax.rsqrt(var + eps)
    shift = beta - mean * scale
    # Lazy per-channel affine: XLA fuses it into the consumer (next im2col / maxpool / add).
    return (y * scale + shift).reshape(n, h, wd, cout)


def _double_conv_block(x, p):
    """down_conv / up_conv: (Conv3x3 -> ReLU -> BN) x 2."""
    h = _conv3x3_relu_bn(x, p["w1"], p["b1"], p["g1"], p["be1"])
    return _conv3x3_relu_bn(h, p["w2"], p["b2"], p["g2"], p["be2"])


def _conv_transpose3x3_s2(x, wt, b):
    """ConvTranspose2d(k=3, s=2, p=1, output_padding=1) as dilate+pad+conv (same Pallas matmul)."""
    n, h, wd, cin = x.shape
    cout = wt.shape[1]
    xd = jnp.zeros((n, 2 * h - 1, 2 * wd - 1, cin), x.dtype).at[:, ::2, ::2, :].set(x)
    xp = jnp.pad(xd, ((0, 0), (1, 2), (1, 2), (0, 0)))          # k-1-p front, +output_padding back
    w_conv = jnp.transpose(wt[:, :, ::-1, ::-1], (1, 0, 2, 3))  # flipped, (Cout, Cin, 3, 3)
    y = _matmul_bias(_im2col_3x3(xp, 2 * h, 2 * wd), _w3x3_to_mat(w_conv), b,
                     relu=False, want_stats=False)
    return y.reshape(n, 2 * h, 2 * wd, cout)


def _conv1x1(x, w, b):
    n, h, wd, cin = x.shape
    cout = w.shape[0]
    y = _matmul_bias(x.reshape(n * h * wd, cin), w.reshape(cout, cin).T, b,
                     relu=False, want_stats=False)
    return y.reshape(n, h, wd, cout)


# -----------------------------------------------------------------------------
# Memory-bound glue (plain JAX).
# TODO(synk): maxpool / adaptive max pool (crop) / nearest resize are left to XLA
# rather than hand-written Pallas kernels.
# -----------------------------------------------------------------------------
def _maxpool2x2_ceil(x):
    n, h, w, c = x.shape
    hp, wp = _round_up(h, 2), _round_up(w, 2)
    if (hp, wp) != (h, w):
        x = jnp.pad(x, ((0, 0), (0, hp - h), (0, wp - w), (0, 0)), constant_values=-jnp.inf)
    return jnp.max(x.reshape(n, hp // 2, 2, wp // 2, 2, c), axis=(2, 4))


def _adaptive_max_pool(x, out_h, out_w):
    """torch.nn.AdaptiveMaxPool2d((out_h, out_w)) on NHWC input."""
    def pool_axis(t, axis, out_size):
        in_size = t.shape[axis]
        if in_size == out_size:
            return t
        i = jnp.arange(out_size)
        starts = (i * in_size) // out_size
        ends = ((i + 1) * in_size + out_size - 1) // out_size
        win = -(-in_size // out_size) + 1
        idx = starts[:, None] + jnp.arange(win)[None, :]
        valid = idx < ends[:, None]
        idx = jnp.minimum(idx, in_size - 1)
        g = jnp.take(t, idx.reshape(-1), axis=axis)
        g = g.reshape(t.shape[:axis] + (out_size, win) + t.shape[axis + 1:])
        mshape = [1] * g.ndim
        mshape[axis], mshape[axis + 1] = out_size, win
        g = jnp.where(valid.reshape(mshape), g, -jnp.inf)
        return jnp.max(g, axis=axis + 1)

    return pool_axis(pool_axis(x, 1, out_h), 2, out_w)


def _nearest_resize(x, out_h, out_w):
    n, h, w, c = x.shape
    if (h, w) == (out_h, out_w):
        return x
    hi = (jnp.arange(out_h) * h) // out_h
    wi = (jnp.arange(out_w) * w) // out_w
    return x[:, hi][:, :, wi]


# -----------------------------------------------------------------------------
# my_FCN forward + parameter init
# -----------------------------------------------------------------------------
def my_fcn_forward(params, x_nchw):
    """Forward pass of my_FCN (training-mode BatchNorm). Input / output are NCHW."""
    x = jnp.transpose(x_nchw, (0, 2, 3, 1)).astype(jnp.float32)  # one NCHW->NHWC at the boundary
    h, w = x.shape[1], x.shape[2]
    mean = jnp.asarray([0.5, 0.5, 0.5], jnp.float32)
    std = jnp.asarray([0.25, 0.25, 0.25], jnp.float32)
    z = (x - mean) / std

    conv1 = _double_conv_block(z, params["down1"])
    mx1 = _maxpool2x2_ceil(conv1)
    conv2 = _double_conv_block(mx1, params["down2"])
    mx2 = _maxpool2x2_ceil(conv2)
    conv3 = _double_conv_block(mx2, params["down3"])
    # (reference computes mx3 = maxpool(conv3) but never uses it -- skipped)
    conv4 = _double_conv_block(conv3, params["down4"])

    score = _conv_transpose3x3_s2(conv4, params["bt_w"], params["bt_b"])
    score = score + _adaptive_max_pool(conv3, score.shape[1], score.shape[2])
    score = _double_conv_block(score, params["up3"])
    score = _conv_transpose3x3_s2(score, params["up_w"], params["up_b"])
    score = score + _adaptive_max_pool(conv1, score.shape[1], score.shape[2])
    score = _conv1x1(score, params["cls_w"], params["cls_b"])

    out = _nearest_resize(score, h, w)[:, :h, :w, :]
    return jnp.transpose(out, (0, 3, 1, 2))


def init_my_fcn_params(key, n_class=N_CLASSES):
    a, b, c, d = 32, 64, 128, 256

    def conv_init(k, cout, cin, ks):
        bound = 1.0 / float(cin * ks * ks) ** 0.5
        kw, kb = jax.random.split(k)
        return (jax.random.uniform(kw, (cout, cin, ks, ks), jnp.float32, -bound, bound),
                jax.random.uniform(kb, (cout,), jnp.float32, -bound, bound))

    def block_init(k, cin, cout):
        k1, k2 = jax.random.split(k)
        w1, b1 = conv_init(k1, cout, cin, 3)
        w2, b2 = conv_init(k2, cout, cout, 3)
        ones, zeros = jnp.ones((cout,), jnp.float32), jnp.zeros((cout,), jnp.float32)
        return dict(w1=w1, b1=b1, g1=ones, be1=zeros, w2=w2, b2=b2, g2=ones, be2=zeros)

    def convt_init(k, cin, cout):
        bound = 1.0 / float(cout * 9) ** 0.5
        kw, kb = jax.random.split(k)
        return (jax.random.uniform(kw, (cin, cout, 3, 3), jnp.float32, -bound, bound),
                jax.random.uniform(kb, (cout,), jnp.float32, -bound, bound))

    ks = jax.random.split(key, 8)
    p = {
        "down1": block_init(ks[0], 3, a),
        "down2": block_init(ks[1], a, b),
        "down3": block_init(ks[2], b, c),
        "down4": block_init(ks[3], c, d),
        "up3": block_init(ks[4], c, b),
    }
    p["bt_w"], p["bt_b"] = convt_init(ks[5], d, c)
    p["up_w"], p["up_b"] = convt_init(ks[6], b, a)
    p["cls_w"], p["cls_b"] = conv_init(ks[7], n_class, a, 1)
    return p


if __name__ == "__main__":
    key = jax.random.PRNGKey(0)
    k_x, k_p, k_a, k_b, k_c, k_d, k_e = jax.random.split(key, 7)

    # --- numerical self-check of the Pallas matmul kernel (bf16 MXU vs f32 ref) ---
    xt = jax.random.normal(k_a, (300, 50), jnp.float32)   # exercises M/K/Cout padding + 2 grid tiles
    wt = jax.random.normal(k_b, (50, 40), jnp.float32) * 0.1
    bt = jax.random.normal(k_c, (40,), jnp.float32)
    got, s, ss = _matmul_bias(xt, wt, bt, relu=True, want_stats=True)
    ref = jnp.maximum(jnp.dot(xt, wt, precision=jax.lax.Precision.HIGHEST) + bt, 0.0)
    assert jnp.allclose(got, ref, rtol=5e-2, atol=5e-2), "matmul kernel mismatch"
    assert jnp.allclose(s, ref.sum(0), rtol=5e-2, atol=5e-1), "stats (sum) mismatch"
    assert jnp.allclose(ss, (ref * ref).sum(0), rtol=5e-2, atol=5e-1), "stats (sumsq) mismatch"

    # --- conv+relu+bn stage check against lax.conv (validates im2col / weight layout / BN) ---
    xs = jax.random.normal(k_d, (2, 5, 6, 7), jnp.float32)
    ws = jax.random.normal(k_e, (13, 7, 3, 3), jnp.float32) * 0.2
    bs = jnp.linspace(-0.5, 0.5, 13, dtype=jnp.float32)
    gs = jnp.linspace(0.5, 1.5, 13, dtype=jnp.float32)
    bes = jnp.linspace(-0.2, 0.2, 13, dtype=jnp.float32)
    got2 = _conv3x3_relu_bn(xs, ws, bs, gs, bes)
    refc = jax.lax.conv_general_dilated(xs, ws, (1, 1), "SAME",
                                        dimension_numbers=("NHWC", "OIHW", "NHWC"),
                                        precision=jax.lax.Precision.HIGHEST)
    refc = jnp.maximum(refc + bs, 0.0)
    mu = refc.mean(axis=(0, 1, 2))
    va = refc.var(axis=(0, 1, 2))
    refc = (refc - mu) * (gs * jax.lax.rsqrt(va + 1e-5)) + bes
    assert jnp.allclose(got2, refc, rtol=8e-2, atol=8e-2), "conv+relu+bn stage mismatch"

    # --- full my_FCN forward ---
    n, cin, hh, ww = 2, 3, 16, 16
    x = jax.random.normal(k_x, (n, cin, hh, ww), jnp.float32)
    params = init_my_fcn_params(k_p)
    y = jax.jit(my_fcn_forward)(params, x)
    y = jax.block_until_ready(y)
    assert y.shape == (n, N_CLASSES, hh, ww)
    assert y.dtype == jnp.float32
    assert bool(jnp.all(jnp.isfinite(y)))
    print("KERNEL_OK")
</pallas_src>

<mosaic_0001>
module attributes {stable_mosaic.version = 11 : i64} {
  func.func @_matmul_bias_kernel(%arg0: i32, %arg1: memref<256x128xbf16, #tpu.memory_space<vmem>>, %arg2: memref<128x128xbf16, #tpu.memory_space<vmem>>, %arg3: memref<1x128xf32, #tpu.memory_space<vmem>>, %arg4: memref<256x128xf32, #tpu.memory_space<vmem>>, %arg5: memref<1x1x128xf32, #tpu.memory_space<vmem>>, %arg6: memref<1x1x128xf32, #tpu.memory_space<vmem>>) attributes {dimension_semantics = [#tpu.dimension_semantics<parallel>], iteration_bounds = array<i64: 2>, scalar_prefetch = 0 : i64, scratch_operands = 0 : i64, tpu.core_type = #tpu.core_type<tc>, window_params = [{transform_indices = @transform_0, window_bounds = array<i64: 256, 128>}, {pipeline_mode = #tpu.pipeline_mode<synchronous>, transform_indices = @transform_1, window_bounds = array<i64: 128, 128>}, {pipeline_mode = #tpu.pipeline_mode<synchronous>, transform_indices = @transform_2, window_bounds = array<i64: 1, 128>}, {transform_indices = @transform_3, window_bounds = array<i64: 256, 128>}, {transform_indices = @transform_4, window_bounds = array<i64: 1, 1, 128>}, {transform_indices = @transform_5, window_bounds = array<i64: 1, 1, 128>}]} {
    %c0 = arith.constant 0 : index
    %c0_0 = arith.constant 0 : index
    %0 = vector.load %arg1[%c0, %c0_0] : memref<256x128xbf16, #tpu.memory_space<vmem>>, vector<256x128xbf16>
    %c0_1 = arith.constant 0 : index
    %c0_2 = arith.constant 0 : index
    %1 = vector.load %arg2[%c0_1, %c0_2] : memref<128x128xbf16, #tpu.memory_space<vmem>>, vector<128x128xbf16>
    %cst = arith.constant dense<0.000000e+00> : vector<256x128xf32>
    %2 = tpu.matmul %0, %1, %cst {dimension_numbers = #tpu.dot_dimension_numbers<[1], [0], [0], [1], [0, 0, 1, 1], [], []>} : vector<256x128xbf16>, vector<128x128xbf16>, vector<256x128xf32> -> vector<256x128xf32>
    %c0_3 = arith.constant 0 : index
    %c0_4 = arith.constant 0 : index
    %3 = vector.load %arg3[%c0_3, %c0_4] : memref<1x128xf32, #tpu.memory_space<vmem>>, vector<1x128xf32>
    %4 = vector.broadcast %3 : vector<1x128xf32> to vector<256x128xf32>
    %5 = arith.addf %2, %4 : vector<256x128xf32>
    %cst_5 = arith.constant 0.000000e+00 : f32
    %6 = vector.broadcast %cst_5 : f32 to vector<256x128xf32>
    %7 = arith.maximumf %5, %6 : vector<256x128xf32>
    %c0_6 = arith.constant 0 : index
    %c0_7 = arith.constant 0 : index
    %8 = vector.load %arg4[%c0_6, %c0_7] : memref<256x128xf32, #tpu.memory_space<vmem>>, vector<256x128xf32>
    tpu.vector_store %arg4[%c0_6, %c0_7], %7 {strides = array<i32>} : memref<256x128xf32, #tpu.memory_space<vmem>>, vector<256x128xf32>,
    %c256_i32 = arith.constant 256 : i32
    %9 = arith.muli %arg0, %c256_i32 : i32
    %10 = tpu.iota {dimensions = array<i32: 0>} : vector<256x1xi32>
    %11 = vector.broadcast %9 : i32 to vector<256x1xi32>
    %12 = arith.addi %11, %10 : vector<256x1xi32>
    %c300_i32 = arith.constant 300 : i32
    %13 = vector.broadcast %c300_i32 : i32 to vector<256x1xi32>
    %14 = arith.cmpi slt, %12, %13 : vector<256x1xi32>
    %cst_8 = arith.constant 0.000000e+00 : f32
    %15 = vector.shape_cast %14 : vector<256x1xi1> to vector<256x1xi1>
    %16 = vector.broadcast %15 : vector<256x1xi1> to vector<256x128xi1>
    %17 = vector.broadcast %cst_8 : f32 to vector<256x128xf32>
    %18 = arith.select %16, %7, %17 : vector<256x128xi1>, vector<256x128xf32>
    %cst_9 = arith.constant dense<0.000000e+00> : vector<128xf32>
    %19 = vector.multi_reduction <add>, %18, %cst_9 [0] : vector<256x128xf32> to vector<128xf32>
    %20 = vector.shape_cast %19 : vector<128xf32> to vector<1x128xf32>
    %21 = vector.shape_cast %20 : vector<1x128xf32> to vector<1x1x128xf32>
    %c0_10 = arith.constant 0 : index
    %c0_11 = arith.constant 0 : index
    %c0_12 = arith.constant 0 : index
    %22 = vector.load %arg5[%c0_10, %c0_11, %c0_12] : memref<1x1x128xf32, #tpu.memory_space<vmem>>, vector<1x1x128xf32>
    tpu.vector_store %arg5[%c0_10, %c0_11, %c0_12], %21 {strides = array<i32>} : memref<1x1x128xf32, #tpu.memory_space<vmem>>, vector<1x1x128xf32>,
    %23 = arith.mulf %18, %18 : vector<256x128xf32>
    %cst_13 = arith.constant dense<0.000000e+00> : vector<128xf32>
    %24 = vector.multi_reduction <add>, %23, %cst_13 [0] : vector<256x128xf32> to vector<128xf32>
    %25 = vector.shape_cast %24 : vector<128xf32> to vector<1x128xf32>
    %26 = vector.shape_cast %25 : vector<1x128xf32> to vector<1x1x128xf32>
    %c0_14 = arith.constant 0 : index
    %c0_15 = arith.constant 0 : index
    %c0_16 = arith.constant 0 : index
    %27 = vector.load %arg6[%c0_14, %c0_15, %c0_16] : memref<1x1x128xf32, #tpu.memory_space<vmem>>, vector<1x1x128xf32>
    tpu.vector_store %arg6[%c0_14, %c0_15, %c0_16], %26 {strides = array<i32>} : memref<1x1x128xf32, #tpu.memory_space<vmem>>, vector<1x1x128xf32>,
    return
  }
  func.func @transform_0(%arg0: i32) -> (i32, i32) {
    %c0_i32 = arith.constant 0 : i32
    %c0_i32_0 = arith.constant 0 : i32
    return %arg0, %c0_i32 : i32, i32
  }
  func.func @transform_1(%arg0: i32) -> (i32, i32) {
    %c0_i32 = arith.constant 0 : i32
    %c0_i32_0 = arith.constant 0 : i32
    %c0_i32_1 = arith.constant 0 : i32
    return %c0_i32, %c0_i32_0 : i32, i32
  }
  func.func @transform_2(%arg0: i32) -> (i32, i32) {
    %c0_i32 = arith.constant 0 : i32
    %c0_i32_0 = arith.constant 0 : i32
    %c0_i32_1 = arith.constant 0 : i32
    return %c0_i32, %c0_i32_0 : i32, i32
  }
  func.func @transform_3(%arg0: i32) -> (i32, i32) {
    %c0_i32 = arith.constant 0 : i32
    %c0_i32_0 = arith.constant 0 : i32
    return %arg0, %c0_i32 : i32, i32
  }
  func.func @transform_4(%arg0: i32) -> (i32, i32, i32) {
    %c0_i32 = arith.constant 0 : i32
    %c0_i32_0 = arith.constant 0 : i32
    %c0_i32_1 = arith.constant 0 : i32
    return %arg0, %c0_i32, %c0_i32_0 : i32, i32, i32
  }
  func.func @transform_5(%arg0: i32) -> (i32, i32, i32) {
    %c0_i32 = arith.constant 0 : i32
    %c0_i32_0 = arith.constant 0 : i32
    %c0_i32_1 = arith.constant 0 : i32
    return %arg0, %c0_i32, %c0_i32_0 : i32, i32, i32
  }
}

</mosaic_0001>

<bundles_post_ra>
// kernel: tpu_custom_call.1
= control target key start
LH: loop header
LB: loop body
LE: loop exit
PB: predicated region body
PF: predicated region fallthrough
CT: control target
= control target key end

     0   :  { %11 = vsyncpa [#allocation3], 0  ;;  %s2182_s0 = inlined_call_operand.hbm [shape: bf16[512,128], index: 0, kind: input, shape index: {}]   ;;  %s2183_s1 = inlined_call_operand.hbm [shape: bf16[128,128], index: 1, kind: input, shape index: {}]   ;;  %s2184_s2 = inlined_call_operand.vmem [shape: f32[1,128], index: 2, kind: input, shape index: {}]   ;;  %s2185_s3 = inlined_call_operand.hbm [shape: f32[512,128], index: 3, kind: output, shape index: {0}]   ;;  %s2186_s4 = inlined_call_operand.hbm [shape: f32[2,1,128], index: 4, kind: output, shape index: {1}]   ;;  %s2187_s5 = inlined_call_operand.hbm [shape: f32[2,1,128], index: 5, kind: output, shape index: {2}]  }
   0x1   :  { %13 = vsyncpa [#allocation3 + $0x1], 0 }
   0x2   :  { %14 = vsyncpa [#allocation6], 0 }
   0x3   :  { %15 = vsyncpa [#allocation4], 0 }
   0x4   :  { %17 = vsyncpa [#allocation4 + $0x1], 0 }
   0x5   :  { %18 = vsyncpa [#allocation9], 0 }
   0x6   :  { %20 = vsyncpa [#allocation9 + $0x1], 0  ;;  %s1580_s18 = smov 0   ;;  %s1582_s19 = smov 0  }
   0x7   :  { %s1584_s20 = smov 0   ;;  %s1586_s21 = smov 0  }
   0x8 LB: > { %s1601_s22 = sadd.s32 4294967295, %s1543_s21   ;;  %s2188_s23 = sadd.s32 4294967294, %s1543_s21   ;;  %s1543_s21 = sphi %s1586_s21, %s2209_s21   ;;  %s1539_s20 = sphi %s1584_s20, %s2208_s20   ;;  %s1535_s19 = sphi %s1582_s19, %s2207_s19   ;;  %s1531_s18 = sphi %s1580_s18, %s2206_s18  }
   0x9   : > { %p46_p0 = scmp.ne.s32.totalorder %s1535_s19, %s1531_s18  ;;  %p47_p1 = scmp.eq.s32.totalorder %s1601_s22, 0 }
   0xa   : > { %p112_p2 = scmp.eq.s32.totalorder %s1601_s22, 1  ;;  %p118_p3 = scmp.eq.s32.totalorder %s2188_s23, 1 }
   0xb   : > { %p1612_p4 = por %p47_p1, %p46_p0  ;;  %p1119_p5 = scmp.ge.s32.totalorder %s1543_s21, 1 }
   0xc   : > { %p1617_p6 = por %p118_p3, %p46_p0  ;;  %p177_p7 = scmp.lt.s32.totalorder %s1543_s21, 3 }
   0xd   : > { %s188_s28 = sshll.u32 %s2183_s1, 4  ;;  %s1545_s30 = smov [#allocation5]   ;;  %s189_s28 = int_to_ptr.hbm [resolvable:$true] %s188_s28 }
   0xe   : > { %p1625_p8 = pnand %p1119_p5, %p177_p7  ;;  %s190_s6 = sshll.u32 %s1545_s30, 4  ;;  %s191_s6 = int_to_ptr.vmem [resolvable:$true] %s190_s6 }
   0xf   : > { %s1635_s7 = sadd.s32 1, %s1543_s21   ;;  %s2189_s8 = smov 64  }
  0x10   : > { %p1293_p9 = pneg %p1625_p8  ;;  %s1547_s9 = smov 4  }
  0x11   : > { %s30_s10 = ssub.s32 %s1543_s21, %s1635_s7  ;;  %s33_s11 = sadd.s32 1, %s1539_s20 }
  0x12   : > { %p1294_p10 = pnand %p1293_p9, %p47_p1  ;;  %p31_p12 = scmp.eq.s32.totalorder %s30_s10, 0 }
  0x13   : > { %p40_p13 = scmp.ne.s32.totalorder %s1539_s20, %s1535_s19  ;;  %p41_p0 = scmp.eq.s32.totalorder %s1543_s21, 0 }
  0x14   : > { %1296 = dma.hbm_to_vmem [thread:$0]  (!%p1294_p10), %s189_s28, 1024, %s191_s6, [#allocation6], %s2189_s8, %s2189_s8, %s1547_s9  }
  0x15   : > { %s1647_s12 = scalar_select %p31_p12, %s1539_s20, %s33_s11  }
  0x16   : > { %p1651_p3 = por %p112_p2, %p40_p13  ;;  %p1312_p5 = scmp.lt.s32.totalorder %s1543_s21, 2 }
  0x17   : > { %s207_s14 = sand.u32 1, %s1539_s20   ;;  %s1231_s15 = sshll.u32 %s1543_s21, 7 }
  0x18   : > { %p42_p7 = por %p41_p0, %p40_p13  ;;  %s1122_s16 = sshll.u32 %s207_s14, 7 }
  0x19   : > { %s216_s27 = scalar_lea.hbm %s2182_s0, %s1231_s15  ;;  %s211_s30 = scalar_lea.vmem [#allocation2], %s1122_s16 }
  0x1a   : > { %s217_s28 = sshll.u32 %s216_s27, 4  ;;  %s219_s6 = sshll.u32 %s211_s30, 4  ;;  %s218_s28 = int_to_ptr.hbm [resolvable:$true] %s217_s28  ;;  %s220_s6 = int_to_ptr.vmem [resolvable:$true] %s219_s6 }
  0x1b   : > { %p1661_p9 = pnand %p1312_p5, %p42_p7  ;;  %s208_s11 = scalar_lea.sflag [#allocation3], %s207_s14 }
  0x1c   : > { %s1383_s23 = sshra.s32 %s218_s28, 4  ;;  %s1390_s16 = scalar_lea.hbm %s2182_s0, 256  ;;  %s1384_s23 = int_to_ptr.hbm [resolvable:$true] %s1383_s23 }
  0x1d   : > { %s1385_s8 = scalar_lea.hbm %s1384_s23, 128  ;;  %p1387_p10 = pneg %p1661_p9 }
  0x1e   : > { %p1386_p2 = scmp.ne.s32.totalorder %s1384_s23, %s1385_s8  ;;  %p1391_p0 = scmp.lt.s32.totalorder %s1384_s23, %s2182_s0 }
  0x1f   : > { %p1392_p5 = scmp.lt.s32.totalorder %s1390_s16, %s1385_s8 }
  0x20   : > { %p1388_p12 = pnand %p1387_p10, %p1386_p2 }
  0x21   : > { %p1393_p7 = por %p1392_p5, %p1391_p0 }
  0x22   : > { %p1389_p13 = pneg %p1388_p12 }
  0x24   : > { %p1394_p11 = pnand %p1393_p7, %p1389_p13 }
  0x26   : > { %1397 = shalt.err (!%p1394_p11)
}
  0x27   : > { %s2199_s14 = smov 64   ;;  %231 = sbr.rel (%p1625_p8) target bundleno = 344 (0x158), region = 32 }
  0x28   : > { %1300 = dma.hbm_to_vmem [thread:$0]  (!%p1661_p9), %s218_s28, 2048, %s220_s6, %s208_s11, %s2199_s14, %s2199_s14, %s1547_s9  }
  0x29   : > { %s1681_s30 = sand.u32 (!%p1625_p8), 1, %s1535_s19  }
  0x2a   : > { %s1126_s23 = sshll.u32 (!%p1625_p8), %s1681_s30, 7  ;;  %s234_s8 = scalar_lea.sflag (!%p1625_p8), [#allocation3], %s1681_s30 }
  0x2b   : > { %s1685_s15 = scalar_lea.vmem (!%p1625_p8), [#allocation2], %s1126_s23 }
  0x2c   : > { %1514 = dma.done.wait (%p1612_p4), %s234_s8, 2048  }
  0x2d   : > { %1516 = vsyncadd (%p1612_p4), %s234_s8, 4294965248 }
  0x2e   : > { %1518 = dma.done.wait (%p47_p1), [#allocation6], 1024  }
  0x2f   : > { %1520 = vsyncadd (%p47_p1), [#allocation6], 4294966272  ;;  %v1255_v0 = vld [vmem:[#allocation5 + $0x38] sm:$0xff]  ;;  %v1254_v1 = vld [vmem:[#allocation5 + $0x30] sm:$0xff]  ;;  %s1128_s9 = sshll.u32 %s1681_s30, 8  ;;  %v630_v61 = vlaneseq  ;;  %s1225_s6 = sshll.u32 %s1601_s22, 8 }
  0x30   : > { %476 = vmatpush.bf16.msra.mxu0 %v1255_v0  ;;  %1257 = vmatpush.bf16.msra.mxu1 %v1255_v0  ;;  %v1253_v2 = vld [vmem:[#allocation5 + $0x28] sm:$0xff]  ;;  %v1252_v3 = vld [vmem:[#allocation5 + $0x20] sm:$0xff]  ;;  %v1251_v4 = vld [vmem:[#allocation5 + $0x18] sm:$0xff]  ;;  %s1725_s28 = scalar_lea.vmem [#allocation7], %s1128_s9  ;;  %s1979_s17 = scalar_lea.hbm %s2185_s3, %s1225_s6 }
  0x31   : > { %1258 = vmatpush.bf16.msra.mxu2 %v1255_v0  ;;  %1259 = vmatpush.bf16.msra.mxu3 %v1255_v0  ;;  %v1250_v5 = vld [vmem:[#allocation5 + $0x10] sm:$0xff]  ;;  %v1249_v6 = vld [vmem:[#allocation5 + $0x8] sm:$0xff]  ;;  %v1248_v7 = vld [vmem:[#allocation5] sm:$0xff]  ;;  %s955_s16 = sshll.u32 %s1979_s17, 4  ;;  %s953_s26 = sshll.u32 %s1725_s28, 4  ;;  %s2008_s16 = int_to_ptr.hbm [resolvable:$true] %s955_s16  ;;  %s2023_s26 = int_to_ptr.vmem [resolvable:$true] %s953_s26 }
  0x32   : > { %v1232_v8 = vld [vmem:[%s1685_s15] sm:$0xff]  ;;  %v1233_v12 = vld [vmem:[%s1685_s15 + $0x8] sm:$0xff]  ;;  %v1234_v16 = vld [vmem:[%s1685_s15 + $0x10] sm:$0xff]  ;;  %s933_s27 = scalar_lea.sflag [#allocation4], %s1681_s30  ;;  %s1427_s14 = sshra.s32 %s2008_s16, 4  ;;  %s1428_s14 = int_to_ptr.hbm [resolvable:$true] %s1427_s14 }
  0x33   : > { %v1236_v9 = vld [vmem:[%s1685_s15 + $0x20] sm:$0xff]  ;;  %v1237_v13 = vld [vmem:[%s1685_s15 + $0x28] sm:$0xff]  ;;  %v1238_v17 = vld [vmem:[%s1685_s15 + $0x30] sm:$0xff]  ;;  %s1429_s23 = scalar_lea.hbm %s1428_s14, 256  ;;  %s1433_s24 = scalar_lea.hbm %s2185_s3, 512 }
  0x34   : > { %477 = vmatpush.bf16.msra.mxu0 %v1254_v1  ;;  %1260 = vmatpush.bf16.msra.mxu1 %v1254_v1  ;;  %v1240_v10 = vld [vmem:[%s1685_s15 + $0x40] sm:$0xff]  ;;  %v1241_v14 = vld [vmem:[%s1685_s15 + $0x48] sm:$0xff]  ;;  %v1242_v18 = vld [vmem:[%s1685_s15 + $0x50] sm:$0xff]  ;;  %p1430_p1 = scmp.ne.s32.totalorder %s1428_s14, %s1429_s23  ;;  %p1434_p11 = scmp.lt.s32.totalorder %s1428_s14, %s2185_s3 }
  0x35   : > { %1261 = vmatpush.bf16.msra.mxu2 %v1254_v1  ;;  %1262 = vmatpush.bf16.msra.mxu3 %v1254_v1  ;;  %v1244_v11 = vld [vmem:[%s1685_s15 + $0x60] sm:$0xff]  ;;  %v1245_v15 = vld [vmem:[%s1685_s15 + $0x68] sm:$0xff]  ;;  %v1246_v19 = vld [vmem:[%s1685_s15 + $0x70] sm:$0xff]  ;;  %p1435_p9 = scmp.lt.s32.totalorder %s1433_s24, %s1429_s23 }
  0x36   : > { %v1235_v20 = vld [vmem:[%s1685_s15 + $0x18] sm:$0xff]  ;;  %v1714_v24 = vld [vmem:[%s2184_s2] ss:$0 sm:$0xff]  ;;  %p1431_p4 = pnand %p1430_p1, %p1651_p3 }
  0x37   : > { %v1239_v21 = vld [vmem:[%s1685_s15 + $0x38] sm:$0xff]  ;;  %p1436_p2 = por %p1435_p9, %p1434_p11 }
  0x38   : > { %478 = vmatpush.bf16.msra.mxu0 %v1253_v2  ;;  %1263 = vmatpush.bf16.msra.mxu1 %v1253_v2  ;;  %v1243_v22 = vld [vmem:[%s1685_s15 + $0x58] sm:$0xff]  ;;  %p1432_p8 = pneg %p1431_p4 }
  0x39   : > { %1264 = vmatpush.bf16.msra.mxu2 %v1253_v2  ;;  %1265 = vmatpush.bf16.msra.mxu3 %v1253_v2  ;;  %v1247_v23 = vld [vmem:[%s1685_s15 + $0x78] sm:$0xff]  ;;  %v1805_v2 = vshrl.u32 %v630_v61, 7 }
  0x3a   : > { %p1437_p10 = pnand %p1436_p2, %p1432_p8 }
  0x3c   : > { %479 = vmatpush.bf16.msra.mxu0 %v1252_v3  ;;  %1266 = vmatpush.bf16.msra.mxu1 %v1252_v3 }
  0x3d   : > { %1267 = vmatpush.bf16.msra.mxu2 %v1252_v3  ;;  %1268 = vmatpush.bf16.msra.mxu3 %v1252_v3 }
  0x40   : > { %480 = vmatpush.bf16.msra.mxu0 %v1251_v4  ;;  %1269 = vmatpush.bf16.msra.mxu1 %v1251_v4 }
  0x41   : > { %1270 = vmatpush.bf16.msra.mxu2 %v1251_v4  ;;  %1271 = vmatpush.bf16.msra.mxu3 %v1251_v4  ;;  %v632_v4 = vadd.s32 8, %v1805_v2 }
  0x44   : > { %481 = vmatpush.bf16.msra.mxu0 %v1250_v5  ;;  %1272 = vmatpush.bf16.msra.mxu1 %v1250_v5 }
  0x45   : > { %1273 = vmatpush.bf16.msra.mxu2 %v1250_v5  ;;  %1274 = vmatpush.bf16.msra.mxu3 %v1250_v5 }
  0x48   : > { %482 = vmatpush.bf16.msra.mxu0 %v1249_v6  ;;  %1275 = vmatpush.bf16.msra.mxu1 %v1249_v6 }
  0x49   : > { %1276 = vmatpush.bf16.msra.mxu2 %v1249_v6  ;;  %1277 = vmatpush.bf16.msra.mxu3 %v1249_v6 }
  0x4c   : > { %483 = vmatpush.bf16.msra.mxu0 %v1248_v7  ;;  %1278 = vmatpush.bf16.msra.mxu1 %v1248_v7 }
  0x4d   : > { %1279 = vmatpush.bf16.msra.mxu2 %v1248_v7  ;;  %1280 = vmatpush.bf16.msra.mxu3 %v1248_v7 }
  0x4f   : > { %484 = vmatmul.bf16.vlgmr.msra.gmra.mxu0 %v1232_v8  ;;  %504 = vmatmul.bf16.vlgmr.msra.gmra.mxu1 %v1236_v9  ;;  %v1819_v8 = vstv %s1225_s6 }
  0x50   : > { %524 = vmatmul.bf16.vlgmr.msra.gmra.mxu2 %v1240_v10  ;;  %544 = vmatmul.bf16.vlgmr.msra.gmra.mxu3 %v1244_v11 }
  0x5f   : > { %489 = vmatmul.bf16.gmra.mxu0 %v1233_v12  ;;  %509 = vmatmul.bf16.gmra.mxu1 %v1237_v13 }
  0x60   : > { %529 = vmatmul.bf16.gmra.mxu2 %v1241_v14  ;;  %549 = vmatmul.bf16.gmra.mxu3 %v1245_v15 }
  0x6f   : > { %494 = vmatmul.bf16.gmra.mxu0 %v1234_v16  ;;  %514 = vmatmul.bf16.gmra.mxu1 %v1238_v17  ;;  %v664_v17 = vadd.s32 %v1819_v8, %v1805_v2 }
  0x70   : > { %534 = vmatmul.bf16.gmra.mxu2 %v1242_v18  ;;  %554 = vmatmul.bf16.gmra.mxu3 %v1246_v19  ;;  %v665_v18 = vadd.s32 %v1819_v8, %v632_v4  ;;  %v633_v19 = vadd.s32 16, %v1805_v2 }
  0x71   : > { %vm696_vm0 = vcmp.lt.s32.totalorder %v664_v17, 300 }
  0x72   : > { %vm697_vm1 = vcmp.lt.s32.totalorder %v665_v18, 300 }
  0x7f   : > { %499 = vmatmul.bf16.gmra.mxu0 %v1235_v20  ;;  %519 = vmatmul.bf16.gmra.mxu1 %v1239_v21  ;;  %v634_v20 = vadd.s32 24, %v1805_v2  ;;  %v635_v21 = vadd.s32 32, %v1805_v2 }
  0x80   : > { %539 = vmatmul.bf16.gmra.mxu2 %v1243_v22  ;;  %559 = vmatmul.bf16.gmra.mxu3 %v1247_v23  ;;  %v636_v22 = vadd.s32 40, %v1805_v2 }
  0x82   : > { %v669_v4 = vadd.s32 %v1819_v8, %v636_v22 }
  0x84   : > { %vm701_vm5 = vcmp.lt.s32.totalorder %v669_v4, 300 }
  0xcc   : > { %v485_v25 = vpop.f32.mrf.mxu0  ;;  %v505_v26 = vpop.f32.mrf.mxu1 }
  0xcd   : > { %v1718_v27 = vadd.f32 %v1714_v24, %v485_v25  ;;  %v1721_v28 = vadd.f32 %v1714_v24, %v505_v26  ;;  %v666_v26 = vadd.s32 %v1819_v8, %v633_v19  ;;  %v641_v19 = vadd.s32 80, %v1805_v2 }
  0xcf   : > { %v565_v29 = vmax.f32 %v1718_v27, 0.0  ;;  %v573_v30 = vmax.f32 %v1721_v28, 0.0  ;;  %vm698_vm2 = vcmp.lt.s32.totalorder %v666_v26, 300 }
  0xd1   : > { %597 = vst [vmem:[%s1725_s28] sm:$0xff] %v565_v29 }
  0xd2   : > { %605 = vst [vmem:[%s1725_s28 + $0x40] sm:$0xff] %v573_v30 }
  0xd3   : > { %v525_v31 = vpop.f32.mrf.mxu2  ;;  %v545_v37 = vpop.f32.mrf.mxu3 }
  0xd4   : > { %v487_v32 = vpop.f32.mrf.mxu0  ;;  %v507_v33 = vpop.f32.mrf.mxu1  ;;  %v1734_v34 = vadd.f32 %v1714_v24, %v525_v31  ;;  %v1764_v47 = vadd.f32 %v1714_v24, %v545_v37  ;;  %v639_v37 = vadd.s32 64, %v1805_v2 }
  0xd5   : > { %v1737_v35 = vadd.f32 %v1714_v24, %v487_v32  ;;  %v1740_v36 = vadd.f32 %v1714_v24, %v507_v33 }
  0xd6   : > { %v581_v38 = vmax.f32 %v1734_v34, 0.0  ;;  %v589_v52 = vmax.f32 %v1764_v47, 0.0 }
  0xd7   : > { %v566_v39 = vmax.f32 %v1737_v35, 0.0  ;;  %v574_v40 = vmax.f32 %v1740_v36, 0.0  ;;  %v1885_v35 = vadd.s32 %v1819_v8, %v639_v37 }
  0xd8   : > { %613 = vst [vmem:[%s1725_s28 + $0x80] sm:$0xff] %v581_v38 }
  0xd9   : > { %598 = vst [vmem:[%s1725_s28 + $0x8] sm:$0xff] %v566_v39  ;;  %v793_v61 = vsel %vm697_vm1, %v566_v39, 0.0  ;;  %vm704_vm7 = vcmp.lt.s32.totalorder %v1885_v35, 300 }
  0xda   : > { %606 = vst [vmem:[%s1725_s28 + $0x48] sm:$0xff] %v574_v40  ;;  %v863_v39 = vmul.f32 %v793_v61, %v793_v61 }
  0xdb   : > { %v527_v41 = vpop.f32.mrf.mxu2  ;;  %v547_v48 = vpop.f32.mrf.mxu3  ;;  %621 = vst [vmem:[%s1725_s28 + $0xc0] sm:$0xff] %v589_v52 }
  0xdc   : > { %v490_v42 = vpop.f32.mrf.mxu0  ;;  %v510_v43 = vpop.f32.mrf.mxu1  ;;  %v1755_v44 = vadd.f32 %v1714_v24, %v527_v41  ;;  %v1786_v57 = vadd.f32 %v1714_v24, %v547_v48 }
  0xdd   : > { %v1758_v45 = vadd.f32 %v1714_v24, %v490_v42  ;;  %v1761_v46 = vadd.f32 %v1714_v24, %v510_v43 }
  0xde   : > { %v582_v49 = vmax.f32 %v1755_v44, 0.0  ;;  %v590_v1 = vmax.f32 %v1786_v57, 0.0 }
  0xdf   : > { %v567_v50 = vmax.f32 %v1758_v45, 0.0  ;;  %v575_v51 = vmax.f32 %v1761_v46, 0.0 }
  0xe0   : > { %614 = vst [vmem:[%s1725_s28 + $0x88] sm:$0xff] %v582_v49 }
  0xe1   : > { %599 = vst [vmem:[%s1725_s28 + $0x10] sm:$0xff] %v567_v50 }
  0xe2   : > { %607 = vst [vmem:[%s1725_s28 + $0x50] sm:$0xff] %v575_v51 }
  0xe3   : > { %v530_v53 = vpop.f32.mrf.mxu2  ;;  %v550_v60 = vpop.f32.mrf.mxu3  ;;  %622 = vst [vmem:[%s1725_s28 + $0xc8] sm:$0xff] %v590_v1 }
  0xe4   : > { %v492_v54 = vpop.f32.mrf.mxu0  ;;  %v512_v55 = vpop.f32.mrf.mxu1  ;;  %v1783_v56 = vadd.f32 %v1714_v24, %v530_v53  ;;  %v1828_v11 = vadd.f32 %v1714_v24, %v550_v60  ;;  %v640_v53 = vadd.s32 72, %v1805_v2 }
  0xe5   : > { %v1789_v58 = vadd.f32 %v1714_v24, %v492_v54  ;;  %v1792_v59 = vadd.f32 %v1714_v24, %v512_v55  ;;  %v667_v54 = vadd.s32 %v1819_v8, %v634_v20  ;;  %v668_v55 = vadd.s32 %v1819_v8, %v635_v21 }
  0xe6   : > { %v583_v62 = vmax.f32 %v1783_v56, 0.0  ;;  %v2193_v16 = vmax.f32 %v1828_v11, 0.0  ;;  %v1889_v18 = vadd.s32 %v1819_v8, %v640_v53 }
  0xe7   : > { %v568_v63 = vmax.f32 %v1789_v58, 0.0  ;;  %v576_v0 = vmax.f32 %v1792_v59, 0.0  ;;  %vm699_vm3 = vcmp.lt.s32.totalorder %v667_v54, 300  ;;  %vm700_vm4 = vcmp.lt.s32.totalorder %v668_v55, 300 }
  0xe8   : > { %615 = vst [vmem:[%s1725_s28 + $0x90] sm:$0xff] %v583_v62  ;;  %vm705_vm8 = vcmp.lt.s32.totalorder %v1889_v18, 300 }
  0xe9   : > { %600 = vst [vmem:[%s1725_s28 + $0x18] sm:$0xff] %v568_v63 }
  0xea   : > { %608 = vst [vmem:[%s1725_s28 + $0x58] sm:$0xff] %v576_v0 }
  0xeb   : > { %v532_v3 = vpop.f32.mrf.mxu2  ;;  %v552_v12 = vpop.f32.mrf.mxu3  ;;  %623 = vst [vmem:[%s1725_s28 + $0xd0] sm:$0xff] %v2193_v16 }
  0xec   : > { %v495_v5 = vpop.f32.mrf.mxu0  ;;  %v515_v6 = vpop.f32.mrf.mxu1  ;;  %v1815_v7 = vadd.f32 %v1714_v24, %v532_v3  ;;  %v1854_v25 = vadd.f32 %v1714_v24, %v552_v12  ;;  %v637_v12 = vadd.s32 48, %v1805_v2 }
  0xed   : > { %v1822_v9 = vadd.f32 %v1714_v24, %v495_v5  ;;  %v1825_v10 = vadd.f32 %v1714_v24, %v515_v6  ;;  %v792_v6 = vsel %vm696_vm0, %v565_v29, 0.0  ;;  %v794_v29 = vsel %vm698_vm2, %v567_v50, 0.0 }
  0xee   : > { %v584_v13 = vmax.f32 %v1815_v7, 0.0  ;;  %v2190_v43 = vmax.f32 %v1854_v25, 0.0  ;;  %v862_v27 = vmul.f32 %v792_v6, %v792_v6  ;;  %v824_v20 = vadd.f32 %v793_v61, %v792_v6 }
  0xef   : > { %v569_v14 = vmax.f32 %v1822_v9, 0.0  ;;  %v577_v15 = vmax.f32 %v1825_v10, 0.0  ;;  %v670_v22 = vadd.s32 %v1819_v8, %v637_v12  ;;  %v864_v54 = vmul.f32 %v794_v29, %v794_v29 }
  0xf0   : > { %616 = vst [vmem:[%s1725_s28 + $0x98] sm:$0xff] %v584_v13  ;;  %v894_v53 = vadd.f32 %v863_v39, %v862_v27 }
  0xf1   : > { %601 = vst [vmem:[%s1725_s28 + $0x20] sm:$0xff] %v569_v14  ;;  %v796_v58 = vsel %vm700_vm4, %v569_v14, 0.0  ;;  %vm702_vm6 = vcmp.lt.s32.totalorder %v670_v22, 300 }
  0xf2   : > { %609 = vst [vmem:[%s1725_s28 + $0x60] sm:$0xff] %v577_v15  ;;  %v895_v55 = vadd.f32 %v894_v53, %v864_v54 }
  0xf3   : > { %v535_v23 = vpop.f32.mrf.mxu2  ;;  %v555_v48 = vpop.f32.mrf.mxu3  ;;  %624 = vst [vmem:[%s1725_s28 + $0xd8] sm:$0xff] %v2190_v43 }
  0xf4   : > { %v497_v31 = vpop.f32.mrf.mxu0  ;;  %v517_v32 = vpop.f32.mrf.mxu1  ;;  %v1858_v33 = vadd.f32 %v1714_v24, %v535_v23  ;;  %v638_v23 = vadd.s32 56, %v1805_v2  ;;  %v1909_v37 = vadd.f32 %v1714_v24, %v555_v48 }
  0xf5   : > { %v498_v41 = vadd.f32 %v1714_v24, %v497_v31  ;;  %v1863_v42 = vadd.f32 %v1714_v24, %v517_v32  ;;  %v795_v32 = vsel %vm699_vm3, %v568_v63, 0.0 }
  0xf6   : > { %v585_v60 = vmax.f32 %v1858_v33, 0.0  ;;  %v2191_v48 = vmax.f32 %v1909_v37, 0.0  ;;  %v671_v14 = vadd.s32 %v1819_v8, %v638_v23 }
  0xf7   : > { %v570_v3 = vmax.f32 %v498_v41, 0.0  ;;  %v578_v5 = vmax.f32 %v1863_v42, 0.0 }
  0xf8   : > { %617 = vst [vmem:[%s1725_s28 + $0xa0] sm:$0xff] %v585_v60  ;;  %vm703_vm9 = vcmp.lt.s32.totalorder %v671_v14, 300 }
  0xf9   : > { %602 = vst [vmem:[%s1725_s28 + $0x28] sm:$0xff] %v570_v3  ;;  %v797_v9 = vsel %vm701_vm5, %v570_v3, 0.0 }
  0xfa   : > { %610 = vst [vmem:[%s1725_s28 + $0x68] sm:$0xff] %v578_v5  ;;  %v867_v53 = vmul.f32 %v797_v9, %v797_v9 }
  0xfb   : > { %v537_v17 = vpop.f32.mrf.mxu2  ;;  %v557_v41 = vpop.f32.mrf.mxu3  ;;  %625 = vst [vmem:[%s1725_s28 + $0xe0] sm:$0xff] %v2191_v48 }
  0xfc   : > { %v500_v21 = vpop.f32.mrf.mxu0  ;;  %v520_v26 = vpop.f32.mrf.mxu1  ;;  %v1900_v31 = vadd.f32 %v1714_v24, %v537_v17  ;;  %v1913_v6 = vadd.f32 %v1714_v24, %v557_v41  ;;  %v825_v17 = vadd.f32 %v824_v20, %v794_v29  ;;  %v647_v29 = vadd.s32 128, %v1805_v2 }
  0xfd   : > { %v501_v45 = vadd.f32 %v1714_v24, %v500_v21  ;;  %v1906_v50 = vadd.f32 %v1714_v24, %v520_v26  ;;  %v865_v21 = vmul.f32 %v795_v32, %v795_v32  ;;  %v866_v20 = vmul.f32 %v796_v58, %v796_v58 }
  0xfe   : > { %v586_v61 = vmax.f32 %v1900_v31, 0.0  ;;  %v2192_v39 = vmax.f32 %v1913_v6, 0.0  ;;  %v826_v27 = vadd.f32 %v825_v17, %v795_v32  ;;  %v674_v26 = vadd.s32 %v1819_v8, %v641_v19 }
  0xff   : > { %v571_v63 = vmax.f32 %v501_v45, 0.0  ;;  %v579_v12 = vmax.f32 %v1906_v50, 0.0  ;;  %v642_v45 = vadd.s32 88, %v1805_v2  ;;  %v1936_v41 = vadd.s32 136, %v1805_v2 }
 0x100   : > { %618 = vst [vmem:[%s1725_s28 + $0xa8] sm:$0xff] %v586_v61  ;;  %v896_v23 = vadd.f32 %v895_v55, %v865_v21  ;;  %v827_v32 = vadd.f32 %v826_v27, %v796_v58  ;;  %v643_v19 = vadd.s32 96, %v1805_v2  ;;  %vm706_vm10 = vcmp.lt.s32.totalorder %v674_v26, 300 }
 0x101   : > { %603 = vst [vmem:[%s1725_s28 + $0x30] sm:$0xff] %v571_v63  ;;  %v798_v3 = vsel %vm702_vm6, %v571_v63, 0.0  ;;  %v675_v48 = vadd.s32 %v1819_v8, %v642_v45  ;;  %v801_v45 = vsel %vm705_vm8, %v574_v40, 0.0  ;;  %v645_v40 = vadd.s32 112, %v1805_v2 }
 0x102   : > { %611 = vst [vmem:[%s1725_s28 + $0x70] sm:$0xff] %v579_v12  ;;  %v897_v58 = vadd.f32 %v896_v23, %v866_v20  ;;  %v828_v55 = vadd.f32 %v827_v32, %v797_v9  ;;  %v868_v27 = vmul.f32 %v798_v3, %v798_v3  ;;  %v1969_v23 = vadd.s32 %v1819_v8, %v647_v29 }
 0x103   : > { %v540_v4 = vpop.f32.mrf.mxu2  ;;  %626 = vst [vmem:[%s1725_s28 + $0xe8] sm:$0xff] %v2192_v39  ;;  %v560_v21 = vpop.f32.mrf.mxu3  ;;  %v644_v39 = vadd.s32 104, %v1805_v2  ;;  %v676_v28 = vadd.s32 %v1819_v8, %v643_v19  ;;  %vm707_vm11 = vcmp.lt.s32.totalorder %v675_v48, 300  ;;  %v646_v19 = vadd.s32 120, %v1805_v2 }
 0x104   : > { %v502_v54 = vpop.f32.mrf.mxu0  ;;  %v522_v17 = vpop.f32.mrf.mxu1  ;;  %v1943_v43 = vadd.f32 %v1714_v24, %v540_v4  ;;  %v898_v20 = vadd.f32 %v897_v58, %v867_v53  ;;  %v829_v9 = vadd.f32 %v828_v55, %v798_v3  ;;  %v871_v58 = vmul.f32 %v801_v45, %v801_v45 }
 0x105   : > { %v503_v22 = vadd.f32 %v1714_v24, %v502_v54  ;;  %v1951_v63 = vadd.f32 %v1714_v24, %v522_v17  ;;  %v800_v17 = vsel %vm704_vm7, %v573_v30, 0.0  ;;  %v677_v14 = vadd.s32 %v1819_v8, %v644_v39 }
 0x106   : > { %v587_v4 = vmax.f32 %v1943_v43, 0.0  ;;  %v899_v30 = vadd.f32 %v898_v20, %v868_v27  ;;  %v870_v18 = vmul.f32 %v800_v17, %v800_v17  ;;  %vm708_vm12 = vcmp.lt.s32.totalorder %v676_v28, 300 }
 0x107   : > { %v572_v16 = vmax.f32 %v503_v22, 0.0  ;;  %v580_v54 = vmax.f32 %v1951_v63, 0.0  ;;  %v649_v55 = vadd.s32 144, %v1805_v2  ;;  %v1996_v46 = vadd.f32 %v1714_v24, %v560_v21 }
 0x108   : > { %619 = vst [vmem:[%s1725_s28 + $0xb0] sm:$0xff] %v587_v4  ;;  %v678_v27 = vadd.s32 %v1819_v8, %v645_v40  ;;  %vm709_vm13 = vcmp.lt.s32.totalorder %v677_v14, 300  ;;  %v681_v59 = vadd.s32 %v1819_v8, %v1936_v41  ;;  %vm712_vm15 = vcmp.lt.s32.totalorder %v1969_v23, 300 }
 0x109   : > { %604 = vst [vmem:[%s1725_s28 + $0x38] sm:$0xff] %v572_v16  ;;  %v799_v35 = vsel %vm703_vm9, %v572_v16, 0.0  ;;  %v802_v16 = vsel %vm706_vm10, %v575_v51, 0.0  ;;  %v682_v10 = vadd.s32 %v1819_v8, %v649_v55  ;;  %v650_v41 = vadd.s32 152, %v1805_v2 }
 0x10a   : > { %v830_v36 = vadd.f32 %v829_v9, %v799_v35  ;;  %v869_v3 = vmul.f32 %v799_v35, %v799_v35  ;;  %612 = vst [vmem:[%s1725_s28 + $0x78] sm:$0xff] %v580_v54  ;;  %v872_v20 = vmul.f32 %v802_v16, %v802_v16  ;;  %v803_v9 = vsel %vm707_vm11, %v576_v0, 0.0 }
 0x10b   : > { %v542_v29 = vpop.f32.mrf.mxu2  ;;  %v562_v51 = vpop.f32.mrf.mxu3  ;;  %v595_v35 = vmax.f32 %v1996_v46, 0.0  ;;  %v804_v0 = vsel %vm708_vm12, %v577_v15, 0.0  ;;  %v873_v48 = vmul.f32 %v803_v9, %v803_v9  ;;  %vm710_vm14 = vcmp.lt.s32.totalorder %v678_v27, 300 }
 0x10c   : > { %v831_v32 = vadd.f32 %v830_v36, %v800_v17  ;;  %v900_v53 = vadd.f32 %v899_v30, %v869_v3  ;;  %v1991_v22 = vadd.f32 %v1714_v24, %v542_v29  ;;  %v2006_v21 = vadd.f32 %v1714_v24, %v562_v51 }
 0x10d   : > { %v679_v36 = vadd.s32 %v1819_v8, %v646_v19  ;;  %627 = vst [vmem:[%s1725_s28 + $0xf0] sm:$0xff] %v595_v35  ;;  %v805_v15 = vsel %vm709_vm13, %v578_v5, 0.0  ;;  %v874_v28 = vmul.f32 %v804_v0, %v804_v0 }
 0x10e   : > { %v832_v39 = vadd.f32 %v831_v32, %v801_v45  ;;  %v901_v26 = vadd.f32 %v900_v53, %v870_v18  ;;  %v588_v17 = vmax.f32 %v1991_v22, 0.0  ;;  %v596_v24 = vmax.f32 %v2006_v21, 0.0 }
 0x10f   : > { %vm711_vm0 = vcmp.lt.s32.totalorder %v679_v36, 300 }
 0x110   : > { %v833_v45 = vadd.f32 %v832_v39, %v802_v16  ;;  %v902_v30 = vadd.f32 %v901_v26, %v871_v58  ;;  %620 = vst [vmem:[%s1725_s28 + $0xb8] sm:$0xff] %v588_v17 }
 0x111   : > { %628 = vst [vmem:[%s1725_s28 + $0xf8] sm:$0xff] %v596_v24 }
 0x112   : > { %v903_v3 = vadd.f32 %v902_v30, %v872_v20  ;;  %v834_v40 = vadd.f32 %v833_v45, %v803_v9 }
 0x114   : > { %v835_v18 = vadd.f32 %v834_v40, %v804_v0  ;;  %v904_v16 = vadd.f32 %v903_v3, %v873_v48 }
 0x115   : > { %1440 = shalt.err (!%p1437_p10)
}
 0x116   : > { %s1548_s28 = smov 128   ;;  %s1549_s6 = smov 8   ;;  %v806_v42 = vsel %vm710_vm14, %v579_v12, 0.0  ;;  %v651_v5 = vadd.s32 160, %v1805_v2  ;;  %vm713_vm1 = vcmp.lt.s32.totalorder %v681_v59, 300  ;;  %v875_v14 = vmul.f32 %v805_v15, %v805_v15 }
 0x117   : > { %1287 = dma.vmem_to_hbm [thread:$0]  (%p1651_p3), %s2023_s26, 4096, %s2008_s16, %s933_s27, %s1548_s28, %s1548_s28, %s1549_s6   ;;  %v836_v29 = vadd.f32 %v835_v18, %v805_v15  ;;  %v905_v32 = vadd.f32 %v904_v16, %v874_v28  ;;  %v808_v53 = vsel %vm712_vm15, %v581_v38, 0.0  ;;  %vm714_vm2 = vcmp.lt.s32.totalorder %v682_v10, 300 }
 0x118   : > { %v683_v19 = vadd.s32 %v1819_v8, %v650_v41  ;;  %v807_v50 = vsel %vm711_vm0, %v580_v54, 0.0  ;;  %v876_v12 = vmul.f32 %v806_v42, %v806_v42  ;;  %v652_v51 = vadd.s32 168, %v1805_v2  ;;  %s967_s17 = scalar_lea.hbm %s2186_s4, %s1601_s22  ;;  %s937_s16 = sand.u32 1, %s1601_s22  }
 0x119   : > { %v837_v58 = vadd.f32 %v836_v29, %v806_v42  ;;  %v906_v55 = vadd.f32 %v905_v32, %v875_v14  ;;  %v809_v39 = vsel %vm713_vm1, %v582_v49, 0.0  ;;  %v684_v34 = vadd.s32 %v1819_v8, %v651_v5  ;;  %s980_s14 = scalar_lea.hbm %s2187_s5, %s1601_s22  ;;  %s271_s23 = scalar_lea.vmem [#allocation8], %s1681_s30 }
 0x11a   : > { %v877_v38 = vmul.f32 %v807_v50, %v807_v50  ;;  %v653_v27 = vadd.s32 176, %v1805_v2  ;;  %v878_v20 = vmul.f32 %v808_v53, %v808_v53  ;;  %v810_v63 = vsel %vm714_vm2, %v583_v62, 0.0  ;;  %s2123_s8 = sshll.u32 %s271_s23, 4  ;;  %s2125_s15 = sshll.u32 %s967_s17, 4  ;;  %s970_s8 = int_to_ptr.vmem [resolvable:$true] %s2123_s8  ;;  %s972_s15 = int_to_ptr.hbm [resolvable:$true] %s2125_s15 }
 0x11b   : > { %v907_v26 = vadd.f32 %v906_v55, %v876_v12  ;;  %v838_v23 = vadd.f32 %v837_v58, %v807_v50  ;;  %v655_v54 = vadd.s32 192, %v1805_v2  ;;  %vm715_vm3 = vcmp.lt.s32.totalorder %v683_v19, 300  ;;  %s277_s24 = scalar_lea.vmem [#allocation10], %s1681_s30  ;;  %s2130_s9 = sshll.u32 %s980_s14, 4  ;;  %s985_s9 = int_to_ptr.hbm [resolvable:$true] %s2130_s9 }
 0x11c   : > { %v685_v30 = vadd.s32 %v1819_v8, %v652_v51  ;;  %v654_v44 = vadd.s32 184, %v1805_v2  ;;  %v879_v49 = vmul.f32 %v809_v39, %v809_v39  ;;  %v656_v36 = vadd.s32 200, %v1805_v2  ;;  %s2128_s29 = sshll.u32 %s277_s24, 4  ;;  %s938_s22 = scalar_lea.sflag [#allocation9], %s937_s16  ;;  %s983_s29 = int_to_ptr.vmem [resolvable:$true] %s2128_s29 }
 0x11d   : > { %v839_v9 = vadd.f32 %v838_v23, %v808_v53  ;;  %v908_v45 = vadd.f32 %v907_v26, %v877_v38  ;;  %vm716_vm4 = vcmp.lt.s32.totalorder %v684_v34, 300  ;;  %v686_v48 = vadd.s32 %v1819_v8, %v653_v27  ;;  %s1455_s28 = sshra.s32 %s972_s15, 4  ;;  %s1461_s11 = scalar_lea.hbm %s2186_s4, 2  ;;  %s1456_s28 = int_to_ptr.hbm [resolvable:$true] %s1455_s28 }
 0x11e   : > { %v880_v3 = vmul.f32 %v810_v63, %v810_v63  ;;  %v688_v56 = vadd.s32 %v1819_v8, %v655_v54  ;;  %v811_v62 = vsel %vm715_vm3, %v584_v13, 0.0  ;;  %v657_v40 = vadd.s32 208, %v1805_v2  ;;  %s1457_s6 = scalar_lea.hbm %s1456_s28, 1  ;;  %p1462_p5 = scmp.lt.s32.totalorder %s1456_s28, %s2186_s4 }
 0x11f   : > { %v840_v59 = vadd.f32 %v839_v9, %v809_v39  ;;  %v909_v0 = vadd.f32 %v908_v45, %v878_v20  ;;  %vm717_vm5 = vcmp.lt.s32.totalorder %v685_v30, 300  ;;  %v687_v41 = vadd.s32 %v1819_v8, %v654_v44  ;;  %p1458_p12 = scmp.ne.s32.totalorder %s1456_s28, %s1457_s6  ;;  %p1463_p7 = scmp.lt.s32.totalorder %s1461_s11, %s1457_s6 }
 0x120   : > { %v689_v28 = vadd.s32 %v1819_v8, %v656_v36  ;;  %v812_v18 = vsel %vm716_vm4, %v585_v60, 0.0  ;;  %v881_v16 = vmul.f32 %v811_v62, %v811_v62  ;;  %vm718_vm6 = vcmp.lt.s32.totalorder %v686_v48, 300 }
 0x121   : > { %v910_v10 = vadd.f32 %v909_v0, %v879_v49  ;;  %v841_v15 = vadd.f32 %v840_v59, %v810_v63  ;;  %vm720_vm7 = vcmp.lt.s32.totalorder %v688_v56, 300  ;;  %v690_v7 = vadd.s32 %v1819_v8, %v657_v40  ;;  %p1459_p13 = pnand %p1458_p12, %p1651_p3  ;;  %p1464_p1 = por %p1463_p7, %p1462_p5 }
 0x122   : > { %v813_v13 = vsel %vm717_vm5, %v586_v61, 0.0  ;;  %v658_v14 = vadd.s32 216, %v1805_v2  ;;  %v882_v29 = vmul.f32 %v812_v18, %v812_v18  ;;  %vm719_vm8 = vcmp.lt.s32.totalorder %v687_v41, 300 }
 0x123   : > { %v842_v42 = vadd.f32 %v841_v15, %v811_v62  ;;  %v911_v5 = vadd.f32 %v910_v10, %v880_v3  ;;  %v814_v33 = vsel %vm718_vm6, %v587_v4, 0.0  ;;  %v659_v60 = vadd.s32 224, %v1805_v2  ;;  %p1460_p0 = pneg %p1459_p13 }
 0x124   : > { %vm721_vm9 = vcmp.lt.s32.totalorder %v689_v28, 300  ;;  %v883_v50 = vmul.f32 %v813_v13, %v813_v13  ;;  %v816_v12 = vsel %vm720_vm7, %v589_v52, 0.0  ;;  %vm722_vm10 = vcmp.lt.s32.totalorder %v690_v7, 300 }
 0x125   : > { %v843_v32 = vadd.f32 %v842_v42, %v812_v18  ;;  %v912_v53 = vadd.f32 %v911_v5, %v881_v16  ;;  %v691_v31 = vadd.s32 %v1819_v8, %v658_v14  ;;  %v815_v61 = vsel %vm719_vm8, %v588_v17, 0.0  ;;  %p1465_p4 = pnand %p1464_p1, %p1460_p0 }
 0x126   : > { %v884_v39 = vmul.f32 %v814_v33, %v814_v33  ;;  %v660_v43 = vadd.s32 232, %v1805_v2  ;;  %v817_v4 = vsel %vm721_vm9, %v590_v1, 0.0  ;;  %v692_v34 = vadd.s32 %v1819_v8, %v659_v60 }
 0x127   : > { %v844_v19 = vadd.f32 %v843_v32, %v813_v13  ;;  %v913_v58 = vadd.f32 %v912_v53, %v882_v29  ;;  %v885_v47 = vmul.f32 %v815_v61, %v815_v61  ;;  %v661_v52 = vadd.s32 240, %v1805_v2 }
 0x128   : > { %v886_v38 = vmul.f32 %v816_v12, %v816_v12  ;;  %v2200_v27 = vmax.f32 %v1828_v11, 0.0  ;;  %vm723_vm11 = vcmp.lt.s32.totalorder %v691_v31, 300  ;;  %v693_v63 = vadd.s32 %v1819_v8, %v660_v43 }
 0x129   : > { %v914_v55 = vadd.f32 %v913_v58, %v883_v50  ;;  %v845_v51 = vadd.f32 %v844_v19, %v814_v33  ;;  %v662_v54 = vadd.s32 248, %v1805_v2  ;;  %v887_v57 = vmul.f32 %v817_v4, %v817_v4 }
 0x12a   : > { %v818_v22 = vsel %vm722_vm10, %v2200_v27, 0.0  ;;  %vm724_vm12 = vcmp.lt.s32.totalorder %v692_v34, 300  ;;  %v694_v45 = vadd.s32 %v1819_v8, %v661_v52  ;;  %v2201_v44 = vmax.f32 %v1854_v25, 0.0 }
 0x12b   : > { %v915_v26 = vadd.f32 %v914_v55, %v884_v39  ;;  %v846_v23 = vadd.f32 %v845_v51, %v815_v61  ;;  %v888_v30 = vmul.f32 %v818_v22, %v818_v22  ;;  %vm725_vm13 = vcmp.lt.s32.totalorder %v693_v63, 300 }
 0x12c   : > { %v819_v49 = vsel %vm723_vm11, %v2201_v44, 0.0  ;;  %v695_v59 = vadd.s32 %v1819_v8, %v662_v54  ;;  %v2202_v0 = vmax.f32 %v1909_v37, 0.0  ;;  %vm726_vm14 = vcmp.lt.s32.totalorder %v694_v45, 300 }
 0x12d   : > { %v847_v17 = vadd.f32 %v846_v23, %v816_v12  ;;  %v916_v20 = vadd.f32 %v915_v26, %v885_v47  ;;  %v889_v3 = vmul.f32 %v819_v49, %v819_v49  ;;  %v2203_v62 = vmax.f32 %v1913_v6, 0.0 }
 0x12e   : > { %v820_v48 = vsel %vm724_vm12, %v2202_v0, 0.0  ;;  %vm727_vm15 = vcmp.lt.s32.totalorder %v695_v59, 300  ;;  %v822_v25 = vsel %vm726_vm14, %v595_v35, 0.0 }
 0x12f   : > { %v848_v1 = vadd.f32 %v847_v17, %v817_v4  ;;  %v917_v9 = vadd.f32 %v916_v20, %v886_v38  ;;  %v821_v40 = vsel %vm725_vm13, %v2203_v62, 0.0  ;;  %v890_v10 = vmul.f32 %v820_v48, %v820_v48 }
 0x130   : > { %v891_v8 = vmul.f32 %v821_v40, %v821_v40  ;;  %v823_v18 = vsel %vm727_vm15, %v596_v24, 0.0  ;;  %v892_v6 = vmul.f32 %v822_v25, %v822_v25 }
 0x131   : > { %v918_v36 = vadd.f32 %v917_v9, %v887_v57  ;;  %v849_v11 = vadd.f32 %v848_v1, %v818_v22  ;;  %v893_v13 = vmul.f32 %v823_v18, %v823_v18 }
 0x133   : > { %v850_v2 = vadd.f32 %v849_v11, %v819_v49  ;;  %v919_v56 = vadd.f32 %v918_v36, %v888_v30 }
 0x135   : > { %v851_v15 = vadd.f32 %v850_v2, %v820_v48  ;;  %v920_v41 = vadd.f32 %v919_v56, %v889_v3 }
 0x137   : > { %v852_v28 = vadd.f32 %v851_v15, %v821_v40  ;;  %v921_v37 = vadd.f32 %v920_v41, %v890_v10 }
 0x139   : > { %v922_v16 = vadd.f32 %v921_v37, %v891_v8  ;;  %v853_v42 = vadd.f32 %v852_v28, %v822_v25 }
 0x13b   : > { %v923_v5 = vadd.f32 %v922_v16, %v892_v6  ;;  %v854_v7 = vadd.f32 %v853_v42, %v823_v18 }
 0x13d   : > { %v855_v14 = vrot.slane %v854_v7, 4  ;;  %v924_v46 = vadd.f32 %v923_v5, %v893_v13 }
 0x13f   : > { %v856_v35 = vadd.f32 %v855_v14, %v854_v7  ;;  %v925_v29 = vrot.slane %v924_v46, 4 }
 0x141   : > { %v857_v32 = vrot.slane %v856_v35, 2  ;;  %v926_v53 = vadd.f32 %v925_v29, %v924_v46 }
 0x143   : > { %v858_v21 = vadd.f32 %v857_v32, %v856_v35  ;;  %v927_v24 = vrot.slane %v926_v53, 2 }
 0x145   : > { %v859_v33 = vrot.slane %v858_v21, 1  ;;  %v928_v60 = vadd.f32 %v927_v24, %v926_v53 }
 0x147   : > { %v860_v19 = vadd.f32 %v859_v33, %v858_v21  ;;  %v929_v50 = vrot.slane %v928_v60, 1 }
 0x149   : > { %v930_v58 = vadd.f32 %v929_v50, %v928_v60  ;;  %861 = vst [vmem:[%s271_s23] sm:$0x1] %v860_v19 }
 0x14a   : > { %1468 = shalt.err (!%p1465_p4)
}
 0x14b   : > { %1288 = dma.vmem_to_hbm [thread:$0]  (%p1651_p3), %s970_s8, 16, %s972_s15, %s938_s22   ;;  %931 = vst [vmem:[%s277_s24] sm:$0x1] %v930_v58 }
 0x14c   : > { %s1483_s16 = sshra.s32 %s985_s9, 4  ;;  %s1489_s28 = scalar_lea.hbm %s2187_s5, 2  ;;  %s1484_s16 = int_to_ptr.hbm [resolvable:$true] %s1483_s16 }
 0x14d   : > { %s1485_s27 = scalar_lea.hbm %s1484_s16, 1  ;;  %p1490_p2 = scmp.lt.s32.totalorder %s1484_s16, %s2187_s5 }
 0x14e   : > { %p1486_p8 = scmp.ne.s32.totalorder %s1484_s16, %s1485_s27  ;;  %p1491_p10 = scmp.lt.s32.totalorder %s1489_s28, %s1485_s27 }
 0x150   : > { %p1487_p11 = pnand %p1486_p8, %p1651_p3  ;;  %p1492_p12 = por %p1491_p10, %p1490_p2 }
 0x152   : > { %p1488_p9 = pneg %p1487_p11 }
 0x154   : > { %p1493_p13 = pnand %p1492_p12, %p1488_p9 }
 0x156   : > { %1496 = shalt.err (!%p1493_p13)
}
 0x157   : > { %1289 = dma.vmem_to_hbm [thread:$0]  (%p1651_p3), %s983_s29, 16, %s985_s9, %s938_s22  }
 0x158 PF: > { %s996_s8 = sand.u32 1, %s1531_s18   ;;  %p2204_p0 = scmp.ge.s32.totalorder %s1543_s21, 2 }
 0x159   : > { %s997_s15 = scalar_lea.sflag [#allocation4], %s996_s8 }
 0x15a   : > { %p1302_p5 = pnand %p2204_p0, %p1617_p6 }
 0x15c   : > { %p1303_p7 = pneg %p1302_p5 }
 0x15e   : > { %1522 = dma.done.wait (%p1303_p7), %s997_s15, 4096  }
 0x15f   : > { %1524 = vsyncadd (%p1303_p7), %s997_s15, 4294963200  ;;  %s2205_s24 = sadd.s32 4294967294, %s1543_s21  }
 0x160   : > { %s1006_s13 = sand.u32 1, %s2205_s24  }
 0x161   : > { %s1007_s10 = scalar_lea.sflag [#allocation9], %s1006_s13 }
 0x162   : > { %1526 = dma.done.wait (%p1303_p7), %s1007_s10, 32  }
 0x163   : > { %1528 = vsyncadd (%p1303_p7), %s1007_s10, 4294967264  ;;  %p23_p3 = scmp.ge.s32.totalorder %s1635_s7, 4   ;;  %s2206_s18 = smov %s1535_s19 }
 0x164   : > { %s2207_s19 = smov %s1539_s20  ;;  %s2208_s20 = smov %s1647_s12 }
 0x165   : > { %s2209_s21 = smov %s1635_s7  ;;  %25 = sbr.rel (!%p23_p3) target bundleno = 8 (0x8), region = 113 }
 0x16a   :  { %1021 = vsyncpa [#allocation3], 1 }
 0x16b   :  { %1023 = vsyncpa [#allocation3 + $0x1], 1 }
 0x16c   :  { %1024 = vsyncpa [#allocation6], 1 }
 0x16d   :  { %1025 = vsyncpa [#allocation4], 1 }
 0x16e   :  { %1027 = vsyncpa [#allocation4 + $0x1], 1 }
 0x16f   :  { %1028 = vsyncpa [#allocation9], 1 }
 0x170   :  { %1030 = vsyncpa [#allocation9 + $0x1], 1 }

</bundles_post_ra>
